<compile_context>
chip_gen: v7x
topology: tpu7x:2x2x1
jax: 0.10.0
libtpu: 0.0.40
codegen_flags: <defaults>
</compile_context>

<pallas_src>
import jax
import jax.numpy as jnp
from jax.experimental import pallas as pl
from jax.experimental.pallas import tpu as pltpu


HID1 = 128   # input_layer out features
HID2 = 64    # hidden1 out features (zero-padded to 128 lanes inside the kernel)
LANE = 128   # TPU lane width


def _mish_fast(x):
    """mish(x) = x * tanh(softplus(x)) = x * (w - 1) / (w + 1), w = (1 + e^x)^2.

    One exp + one approx reciprocal (EUP vrcp) instead of exp+log+tanh.
    The clamp avoids exp overflow; the where makes mish(x) == x exactly for
    large x (where tanh(softplus(x)) == 1 in f32 anyway).
    """
    xc = jnp.minimum(x, 20.0)
    e1 = 1.0 + jnp.exp(xc)
    w = e1 * e1                                    # exp(2 * softplus(x))
    t = (w - 1.0) * pl.reciprocal(w + 1.0, approx=True)
    return x * jnp.where(x > 20.0, 1.0, t)


def _basenet_kernel(x_ref, w1_ref, b1_ref, w2_ref, b2_ref, w3_ref, b3_ref, o_ref):
    mxu_dt = w1_ref.dtype          # bf16 or f32 MXU operands; accumulation is f32

    x = x_ref[...]

    # input_layer: Linear(in, 128) + Mish   (dropout = identity in eval)
    h = jnp.dot(x.astype(mxu_dt), w1_ref[...],
                preferred_element_type=jnp.float32) + b1_ref[...]
    h = _mish_fast(h)

    # hidden1: Linear(128, 64 -> padded 128) + Mish; mish(0)=0 keeps pad lanes zero.
    h = jnp.dot(h.astype(mxu_dt), w2_ref[...],
                preferred_element_type=jnp.float32) + b2_ref[...]
    h = _mish_fast(h)

    # output: Linear(64 -> padded 128, out -> padded 128)
    o_ref[...] = (jnp.dot(h.astype(mxu_dt), w3_ref[...],
                          preferred_element_type=jnp.float32)
                  + b3_ref[...]).astype(o_ref.dtype)


def basenet_forward(x, packed, *, block_rows=512):
    """x: [B, input_size] float32. packed: output of pack_params()."""
    w1, b1 = packed["w1"], packed["b1"]
    w2, b2 = packed["w2"], packed["b2"]
    w3, b3 = packed["w3"], packed["b3"]
    out_size = packed["out_size"]

    B, in_size = x.shape
    tb = B if B <= block_rows else block_rows     # small B: one full block

    const = lambda a: pl.BlockSpec(a.shape, lambda i: (0,) * a.ndim)

    out_padded = pl.pallas_call(
        _basenet_kernel,
        out_shape=jax.ShapeDtypeStruct((B, LANE), jnp.float32),
        grid=(pl.cdiv(B, tb),),
        in_specs=[pl.BlockSpec((tb, in_size), lambda i: (i, 0)),   # x tile
                  const(w1), const(b1),
                  const(w2), const(b2),
                  const(w3), const(b3)],
        out_specs=pl.BlockSpec((tb, LANE), lambda i: (i, 0)),
        compiler_params=pltpu.CompilerParams(
            dimension_semantics=("parallel",)),
    )(x, w1, b1, w2, b2, w3, b3)

    return out_padded[:, :out_size]


def init_params(key, input_size, output_size):
    """PyTorch-layout (out_f, in_f) weights with uniform(+-1/sqrt(fan_in)) init."""
    def linear(k, fan_in, fan_out):
        kw, kb = jax.random.split(k)
        bound = 1.0 / jnp.sqrt(fan_in)
        w = jax.random.uniform(kw, (fan_out, fan_in), jnp.float32, -bound, bound)
        b = jax.random.uniform(kb, (fan_out,), jnp.float32, -bound, bound)
        return w, b

    k1, k2, k3 = jax.random.split(key, 3)
    w1, b1 = linear(k1, input_size, HID1)    # input_layer
    w2, b2 = linear(k2, HID1, HID2)          # hidden1
    w3, b3 = linear(k3, HID2, output_size)   # output
    # NOTE: hidden2 (Linear(64,128)) exists in __init__ but is unused in forward().
    return {"w1": w1, "b1": b1, "w2": w2, "b2": b2, "w3": w3, "b3": b3}


def pack_params(params, mxu_dtype=jnp.float32):
    """Transpose to (in, out), zero-pad lane-sparse dims to 128, cast MXU operands."""
    def pad_to(a, rows, cols):
        return jnp.zeros((rows, cols), a.dtype).at[:a.shape[0], :a.shape[1]].set(a)

    out_size = params["w3"].shape[0]
    w1 = params["w1"].T                                   # (in, 128)
    w2 = pad_to(params["w2"].T, HID1, LANE)               # (128, 64)  -> (128, 128)
    w3 = pad_to(params["w3"].T, LANE, LANE)               # (64, out)  -> (128, 128)
    b1 = params["b1"].reshape(1, HID1)
    b2 = pad_to(params["b2"].reshape(1, HID2), 1, LANE)
    b3 = pad_to(params["b3"].reshape(1, out_size), 1, LANE)
    return {"w1": w1.astype(mxu_dtype),
            "w2": w2.astype(mxu_dtype),
            "w3": w3.astype(mxu_dtype),
            "b1": b1, "b2": b2, "b3": b3,                 # biases stay f32
            "out_size": out_size}


if __name__ == "__main__":
    key = jax.random.PRNGKey(0)
    k_in, k_p = jax.random.split(key)

    batch, input_size, output_size = 8, 32, 4
    x = jax.random.normal(k_in, (batch, input_size), jnp.float32)
    params = init_params(k_p, input_size, output_size)

    # f32 MXU operands here so the check against the exact reference stays tight.
    # On v6e/v7x, pass mxu_dtype=jnp.bfloat16 for native-rate MXU + halved DMA.
    packed = pack_params(params, mxu_dtype=jnp.float32)

    out = basenet_forward(x, packed)
    jax.block_until_ready(out)

    # Pure-JAX reference with the exact Mish (tanh(softplus)).
    def ref(x, p):
        mish = lambda v: v * jnp.tanh(jnp.logaddexp(v, 0.0))
        h = mish(x @ p["w1"].T + p["b1"])
        h = mish(h @ p["w2"].T + p["b2"])
        return h @ p["w3"].T + p["b3"]

    expected = ref(x, params)
    assert out.shape == (batch, output_size)
    # approx reciprocal in the fast Mish gives ~1e-3 relative error/activation,
    # which compounds slightly through the 3 layers.
    max_err = float(jnp.max(jnp.abs(out - expected)))
    assert jnp.allclose(out, expected, atol=5e-2, rtol=5e-2), max_err

    print("KERNEL_OK")
</pallas_src>

<mosaic_0001>
module attributes {stable_mosaic.version = 11 : i64} {
  func.func @_basenet_kernel(%arg0: i32, %arg1: memref<8x32xf32, #tpu.memory_space<vmem>>, %arg2: memref<32x128xf32, #tpu.memory_space<vmem>>, %arg3: memref<1x128xf32, #tpu.memory_space<vmem>>, %arg4: memref<128x128xf32, #tpu.memory_space<vmem>>, %arg5: memref<1x128xf32, #tpu.memory_space<vmem>>, %arg6: memref<128x128xf32, #tpu.memory_space<vmem>>, %arg7: memref<1x128xf32, #tpu.memory_space<vmem>>, %arg8: memref<8x128xf32, #tpu.memory_space<vmem>>) attributes {dimension_semantics = [#tpu.dimension_semantics<parallel>], iteration_bounds = array<i64: 1>, scalar_prefetch = 0 : i64, scratch_operands = 0 : i64, tpu.core_type = #tpu.core_type<tc>, window_params = [{transform_indices = @transform_0, window_bounds = array<i64: 8, 32>}, {pipeline_mode = #tpu.pipeline_mode<synchronous>, transform_indices = @transform_1, window_bounds = array<i64: 32, 128>}, {pipeline_mode = #tpu.pipeline_mode<synchronous>, transform_indices = @transform_2, window_bounds = array<i64: 1, 128>}, {pipeline_mode = #tpu.pipeline_mode<synchronous>, transform_indices = @transform_3, window_bounds = array<i64: 128, 128>}, {pipeline_mode = #tpu.pipeline_mode<synchronous>, transform_indices = @transform_4, window_bounds = array<i64: 1, 128>}, {pipeline_mode = #tpu.pipeline_mode<synchronous>, transform_indices = @transform_5, window_bounds = array<i64: 128, 128>}, {pipeline_mode = #tpu.pipeline_mode<synchronous>, transform_indices = @transform_6, window_bounds = array<i64: 1, 128>}, {transform_indices = @transform_7, window_bounds = array<i64: 8, 128>}]} {
    %c0 = arith.constant 0 : index
    %c0_0 = arith.constant 0 : index
    %0 = vector.load %arg1[%c0, %c0_0] : memref<8x32xf32, #tpu.memory_space<vmem>>, vector<8x32xf32>
    %c0_1 = arith.constant 0 : index
    %c0_2 = arith.constant 0 : index
    %1 = vector.load %arg2[%c0_1, %c0_2] : memref<32x128xf32, #tpu.memory_space<vmem>>, vector<32x128xf32>
    %cst = arith.constant dense<0.000000e+00> : vector<8x128xf32>
    %2 = tpu.matmul %0, %1, %cst {dimension_numbers = #tpu.dot_dimension_numbers<[1], [0], [0], [1], [0, 0, 1, 1], [], []>} : vector<8x32xf32>, vector<32x128xf32>, vector<8x128xf32> -> vector<8x128xf32>
    %c0_3 = arith.constant 0 : index
    %c0_4 = arith.constant 0 : index
    %3 = vector.load %arg3[%c0_3, %c0_4] : memref<1x128xf32, #tpu.memory_space<vmem>>, vector<1x128xf32>
    %4 = vector.broadcast %3 : vector<1x128xf32> to vector<8x128xf32>
    %5 = arith.addf %2, %4 : vector<8x128xf32>
    %cst_5 = arith.constant 2.000000e+01 : f32
    %6 = vector.broadcast %cst_5 : f32 to vector<8x128xf32>
    %7 = arith.minimumf %5, %6 : vector<8x128xf32>
    %8 = math.exp %7 : vector<8x128xf32>
    %cst_6 = arith.constant 1.000000e+00 : f32
    %9 = vector.broadcast %cst_6 : f32 to vector<8x128xf32>
    %10 = arith.addf %9, %8 : vector<8x128xf32>
    %11 = arith.mulf %10, %10 : vector<8x128xf32>
    %cst_7 = arith.constant 1.000000e+00 : f32
    %12 = vector.broadcast %cst_7 : f32 to vector<8x128xf32>
    %13 = arith.subf %11, %12 : vector<8x128xf32>
    %cst_8 = arith.constant 1.000000e+00 : f32
    %14 = vector.broadcast %cst_8 : f32 to vector<8x128xf32>
    %15 = arith.addf %11, %14 : vector<8x128xf32>
    %16 = tpu.reciprocal %15 {approx = true} : vector<8x128xf32> -> vector<8x128xf32>
    %17 = arith.mulf %13, %16 : vector<8x128xf32>
    %cst_9 = arith.constant 2.000000e+01 : f32
    %18 = vector.broadcast %cst_9 : f32 to vector<8x128xf32>
    %19 = arith.cmpf ogt, %5, %18 : vector<8x128xf32>
    %cst_10 = arith.constant 1.000000e+00 : f32
    %20 = vector.broadcast %cst_10 : f32 to vector<8x128xf32>
    %21 = arith.select %19, %20, %17 : vector<8x128xi1>, vector<8x128xf32>
    %22 = arith.mulf %5, %21 : vector<8x128xf32>
    %c0_11 = arith.constant 0 : index
    %c0_12 = arith.constant 0 : index
    %23 = vector.load %arg4[%c0_11, %c0_12] : memref<128x128xf32, #tpu.memory_space<vmem>>, vector<128x128xf32>
    %cst_13 = arith.constant dense<0.000000e+00> : vector<8x128xf32>
    %24 = tpu.matmul %22, %23, %cst_13 {dimension_numbers = #tpu.dot_dimension_numbers<[1], [0], [0], [1], [0, 0, 1, 1], [], []>} : vector<8x128xf32>, vector<128x128xf32>, vector<8x128xf32> -> vector<8x128xf32>
    %c0_14 = arith.constant 0 : index
    %c0_15 = arith.constant 0 : index
    %25 = vector.load %arg5[%c0_14, %c0_15] : memref<1x128xf32, #tpu.memory_space<vmem>>, vector<1x128xf32>
    %26 = vector.broadcast %25 : vector<1x128xf32> to vector<8x128xf32>
    %27 = arith.addf %24, %26 : vector<8x128xf32>
    %cst_16 = arith.constant 2.000000e+01 : f32
    %28 = vector.broadcast %cst_16 : f32 to vector<8x128xf32>
    %29 = arith.minimumf %27, %28 : vector<8x128xf32>
    %30 = math.exp %29 : vector<8x128xf32>
    %cst_17 = arith.constant 1.000000e+00 : f32
    %31 = vector.broadcast %cst_17 : f32 to vector<8x128xf32>
    %32 = arith.addf %31, %30 : vector<8x128xf32>
    %33 = arith.mulf %32, %32 : vector<8x128xf32>
    %cst_18 = arith.constant 1.000000e+00 : f32
    %34 = vector.broadcast %cst_18 : f32 to vector<8x128xf32>
    %35 = arith.subf %33, %34 : vector<8x128xf32>
    %cst_19 = arith.constant 1.000000e+00 : f32
    %36 = vector.broadcast %cst_19 : f32 to vector<8x128xf32>
    %37 = arith.addf %33, %36 : vector<8x128xf32>
    %38 = tpu.reciprocal %37 {approx = true} : vector<8x128xf32> -> vector<8x128xf32>
    %39 = arith.mulf %35, %38 : vector<8x128xf32>
    %cst_20 = arith.constant 2.000000e+01 : f32
    %40 = vector.broadcast %cst_20 : f32 to vector<8x128xf32>
    %41 = arith.cmpf ogt, %27, %40 : vector<8x128xf32>
    %cst_21 = arith.constant 1.000000e+00 : f32
    %42 = vector.broadcast %cst_21 : f32 to vector<8x128xf32>
    %43 = arith.select %41, %42, %39 : vector<8x128xi1>, vector<8x128xf32>
    %44 = arith.mulf %27, %43 : vector<8x128xf32>
    %c0_22 = arith.constant 0 : index
    %c0_23 = arith.constant 0 : index
    %45 = vector.load %arg6[%c0_22, %c0_23] : memref<128x128xf32, #tpu.memory_space<vmem>>, vector<128x128xf32>
    %cst_24 = arith.constant dense<0.000000e+00> : vector<8x128xf32>
    %46 = tpu.matmul %44, %45, %cst_24 {dimension_numbers = #tpu.dot_dimension_numbers<[1], [0], [0], [1], [0, 0, 1, 1], [], []>} : vector<8x128xf32>, vector<128x128xf32>, vector<8x128xf32> -> vector<8x128xf32>
    %c0_25 = arith.constant 0 : index
    %c0_26 = arith.constant 0 : index
    %47 = vector.load %arg7[%c0_25, %c0_26] : memref<1x128xf32, #tpu.memory_space<vmem>>, vector<1x128xf32>
    %48 = vector.broadcast %47 : vector<1x128xf32> to vector<8x128xf32>
    %49 = arith.addf %46, %48 : vector<8x128xf32>
    %c0_27 = arith.constant 0 : index
    %c0_28 = arith.constant 0 : index
    %50 = vector.load %arg8[%c0_27, %c0_28] : memref<8x128xf32, #tpu.memory_space<vmem>>, vector<8x128xf32>
    tpu.vector_store %arg8[%c0_27, %c0_28], %49 {strides = array<i32>} : memref<8x128xf32, #tpu.memory_space<vmem>>, vector<8x128xf32>,
    return
  }
  func.func @transform_0(%arg0: i32) -> (i32, i32) {
    %c0_i32 = arith.constant 0 : i32
    %c0_i32_0 = arith.constant 0 : i32
    return %arg0, %c0_i32 : i32, i32
  }
  func.func @transform_1(%arg0: i32) -> (i32, i32) {
    %c0_i32 = arith.constant 0 : i32
    %c0_i32_0 = arith.constant 0 : i32
    %c0_i32_1 = arith.constant 0 : i32
    return %c0_i32, %c0_i32_0 : i32, i32
  }
  func.func @transform_2(%arg0: i32) -> (i32, i32) {
    %c0_i32 = arith.constant 0 : i32
    %c0_i32_0 = arith.constant 0 : i32
    %c0_i32_1 = arith.constant 0 : i32
    return %c0_i32, %c0_i32_0 : i32, i32
  }
  func.func @transform_3(%arg0: i32) -> (i32, i32) {
    %c0_i32 = arith.constant 0 : i32
    %c0_i32_0 = arith.constant 0 : i32
    %c0_i32_1 = arith.constant 0 : i32
    return %c0_i32, %c0_i32_0 : i32, i32
  }
  func.func @transform_4(%arg0: i32) -> (i32, i32) {
    %c0_i32 = arith.constant 0 : i32
    %c0_i32_0 = arith.constant 0 : i32
    %c0_i32_1 = arith.constant 0 : i32
    return %c0_i32, %c0_i32_0 : i32, i32
  }
  func.func @transform_5(%arg0: i32) -> (i32, i32) {
    %c0_i32 = arith.constant 0 : i32
    %c0_i32_0 = arith.constant 0 : i32
    %c0_i32_1 = arith.constant 0 : i32
    return %c0_i32, %c0_i32_0 : i32, i32
  }
  func.func @transform_6(%arg0: i32) -> (i32, i32) {
    %c0_i32 = arith.constant 0 : i32
    %c0_i32_0 = arith.constant 0 : i32
    %c0_i32_1 = arith.constant 0 : i32
    return %c0_i32, %c0_i32_0 : i32, i32
  }
  func.func @transform_7(%arg0: i32) -> (i32, i32) {
    %c0_i32 = arith.constant 0 : i32
    %c0_i32_0 = arith.constant 0 : i32
    return %arg0, %c0_i32 : i32, i32
  }
}

</mosaic_0001>

<bundles_post_ra>
// kernel: tpu_custom_call.1
= control target key start
LH: loop header
LB: loop body
LE: loop exit
PB: predicated region body
PF: predicated region fallthrough
CT: control target
= control target key end

     0   :  { %12 = vsyncpa [#allocation3], 0  ;;  %s859_s0 = inlined_call_operand.hbm [shape: f32[8,32], index: 0, kind: input, shape index: {}]   ;;  %s860_s1 = inlined_call_operand.hbm [shape: f32[32,128], index: 1, kind: input, shape index: {}]   ;;  %s861_s2 = inlined_call_operand.vmem [shape: f32[1,128], index: 2, kind: input, shape index: {}]   ;;  %s862_s3 = inlined_call_operand.hbm [shape: f32[128,128], index: 3, kind: input, shape index: {}]   ;;  %s863_s4 = inlined_call_operand.vmem [shape: f32[1,128], index: 4, kind: input, shape index: {}]   ;;  %s864_s5 = inlined_call_operand.hbm [shape: f32[128,128], index: 5, kind: input, shape index: {}]   ;;  %s865_s6 = inlined_call_operand.vmem [shape: f32[1,128], index: 6, kind: input, shape index: {}]   ;;  %s866_s7 = inlined_call_operand.hbm [shape: f32[8,128], index: 7, kind: output, shape index: {}]  }
   0x1   :  { %13 = vsyncpa [#allocation6], 0 }
   0x2   :  { %14 = vsyncpa [#allocation9], 0 }
   0x3   :  { %15 = vsyncpa [#allocation4], 0  ;;  %s710_s24 = smov [#allocation5]   ;;  %s592_s28 = scalar_lea.hbm %s860_s1, 512 }
   0x4   :  { %s31_s25 = sshll.u32 %s710_s24, 4  ;;  %p593_p0 = scmp.ne.s32.totalorder %s860_s1, %s592_s28  ;;  %s32_s25 = int_to_ptr.vmem [resolvable:$true] %s31_s25 }
   0x5   :  { %p596_p1 = scmp.lt.u32.totalorder %s592_s28, %s860_s1 }
   0x7   :  { %p598_p2 = pnand %p596_p1, %p593_p0 }
   0x9   :  { %601 = shalt.err (!%p598_p2)
}
   0xa   :  { %s602_s10 = scalar_lea.vmem %s32_s25, 512  ;;  %p607_p4 = scmp.lt.s32.totalorder %s32_s25, %s32_s25 }
   0xb   :  { %p603_p3 = scmp.ne.s32.totalorder %s32_s25, %s602_s10  ;;  %p608_p5 = scmp.lt.s32.totalorder %s602_s10, %s602_s10 }
   0xd   :  { %p609_p6 = por %p608_p5, %p607_p4 }
   0xf   :  { %p610_p7 = pnand %p609_p6, %p603_p3 }
  0x11   :  { %613 = shalt.err (!%p610_p7)
}
  0x12   :  { %s711_s11 = smov 128   ;;  %s712_s12 = smov 8  }
  0x13   :  { %37 = dma.hbm_to_vmem [thread:$0]  %s860_s1, 512, %s32_s25, [#allocation6], %s711_s11, %s711_s11, %s712_s12  }
  0x14   :  { %s713_s15 = smov [#allocation2]   ;;  %s714_s17 = smov [#allocation7]  }
  0x15   :  { %s22_s16 = sshll.u32 %s713_s15, 4  ;;  %s45_s18 = sshll.u32 %s714_s17, 4  ;;  %s23_s16 = int_to_ptr.vmem [resolvable:$true] %s22_s16  ;;  %s46_s18 = int_to_ptr.vmem [resolvable:$true] %s45_s18 }
  0x16   :  { %s614_s21 = scalar_lea.hbm %s859_s0, 128 }
  0x17   :  { %p615_p8 = scmp.ne.s32.totalorder %s859_s0, %s614_s21  ;;  %p618_p9 = scmp.lt.u32.totalorder %s614_s21, %s859_s0 }
  0x19   :  { %p620_p10 = pnand %p618_p9, %p615_p8 }
  0x1b   :  { %623 = shalt.err (!%p620_p10)
}
  0x1c   :  { %s624_s1 = scalar_lea.vmem %s23_s16, 128  ;;  %p629_p12 = scmp.lt.s32.totalorder %s23_s16, %s23_s16 }
  0x1d   :  { %p625_p11 = scmp.ne.s32.totalorder %s23_s16, %s624_s1  ;;  %p630_p13 = scmp.lt.s32.totalorder %s624_s1, %s624_s1 }
  0x1f   :  { %p631_p0 = por %p630_p13, %p629_p12 }
  0x21   :  { %p632_p1 = pnand %p631_p0, %p625_p11 }
  0x23   :  { %635 = shalt.err (!%p632_p1)
}
  0x24   :  { %25 = dma.hbm_to_vmem [thread:$0]  %s859_s0, 128, %s23_s16, [#allocation3]  }
  0x25   :  { %s636_s30 = scalar_lea.hbm %s862_s3, 2048 }
  0x26   :  { %p637_p2 = scmp.ne.s32.totalorder %s862_s3, %s636_s30  ;;  %p640_p3 = scmp.lt.u32.totalorder %s636_s30, %s862_s3 }
  0x28   :  { %p642_p4 = pnand %p640_p3, %p637_p2 }
  0x2a   :  { %645 = shalt.err (!%p642_p4)
}
  0x2b   :  { %s646_s14 = scalar_lea.vmem %s46_s18, 2048  ;;  %p651_p6 = scmp.lt.s32.totalorder %s46_s18, %s46_s18 }
  0x2c   :  { %p647_p5 = scmp.ne.s32.totalorder %s46_s18, %s646_s14  ;;  %p652_p7 = scmp.lt.s32.totalorder %s646_s14, %s646_s14 }
  0x2e   :  { %p653_p8 = por %p652_p7, %p651_p6 }
  0x30   :  { %p654_p9 = pnand %p653_p8, %p647_p5 }
  0x32   :  { %657 = shalt.err (!%p654_p9)
}
  0x33   :  { %51 = dma.hbm_to_vmem [thread:$0]  %s862_s3, 2048, %s46_s18, [#allocation6], %s711_s11, %s711_s11, %s712_s12  }
  0x34   :  { %s715_s16 = smov [#allocation8]   ;;  %s658_s21 = scalar_lea.hbm %s864_s5, 2048 }
  0x35   :  { %s59_s17 = sshll.u32 %s715_s16, 4  ;;  %p659_p10 = scmp.ne.s32.totalorder %s864_s5, %s658_s21  ;;  %s60_s17 = int_to_ptr.vmem [resolvable:$true] %s59_s17 }
  0x36   :  { %p662_p11 = scmp.lt.u32.totalorder %s658_s21, %s864_s5 }
  0x38   :  { %p664_p12 = pnand %p662_p11, %p659_p10 }
  0x3a   :  { %667 = shalt.err (!%p664_p12)
}
  0x3b   :  { %s668_s1 = scalar_lea.vmem %s60_s17, 2048  ;;  %p673_p0 = scmp.lt.s32.totalorder %s60_s17, %s60_s17 }
  0x3c   :  { %p669_p13 = scmp.ne.s32.totalorder %s60_s17, %s668_s1  ;;  %p674_p1 = scmp.lt.s32.totalorder %s668_s1, %s668_s1 }
  0x3e   :  { %p675_p2 = por %p674_p1, %p673_p0 }
  0x40   :  { %p676_p3 = pnand %p675_p2, %p669_p13 }
  0x42   :  { %679 = shalt.err (!%p676_p3)
}
  0x43   :  { %65 = dma.hbm_to_vmem [thread:$0]  %s864_s5, 2048, %s60_s17, [#allocation9], %s711_s11, %s711_s11, %s712_s12  }
  0x44   :  { %702 = dma.done.wait [#allocation3], 128  }
  0x45   :  { %703 = vsyncadd [#allocation3], 4294967168 }
  0x46   :  { %704 = dma.done.wait [#allocation6], 2560  }
  0x47   :  { %705 = vsyncadd [#allocation6], 4294964736 }
  0x48   :  { %706 = dma.done.wait [#allocation9], 2048  }
  0x49   :  { %707 = vsyncadd [#allocation9], 4294965248  ;;  %v716_v0 = vmov 0.0|0.0   ;;  %vm717_vm0 = vmmov 0   ;;  %v718_v1 = vmov 0.0   ;;  %v81_v2 = vld [vmem:[#allocation5] sm:$0xff] }
  0x4a   :  { %520 = vmatprep.subr.bf16.mxu0 %v716_v0  ;;  %447 = vmatprep.mubr.msk.f32.mxu0 %vm717_vm0, %v718_v1  ;;  %v82_v3 = vld [vmem:[#allocation5 + $0x8] sm:$0xff]  ;;  %v83_v4 = vld [vmem:[#allocation5 + $0x10] sm:$0xff]  ;;  %v84_v6 = vld [vmem:[#allocation5 + $0x18] sm:$0xff]  ;;  %vm92_vm1 = vcmask 261120   ;;  %s719_s27 = smov [#allocation10]  }
  0x4b   :  { %526 = vmatprep.subr.bf16.mxu1 %v716_v0  ;;  %482 = vmatprep.mubr.msk.f32.mxu1 %vm717_vm0, %v718_v1  ;;  %v521_v5 = vpack.c.bf16 %v82_v3, %v81_v2  ;;  %v524_v7 = vpack.c.bf16 %v84_v6, %v83_v4  ;;  %v80_v8 = vld [vmem:[#allocation2] sm:$0xff]  ;;  %v178_v9 = vld [vmem:[#allocation7] sm:$0xff]  ;;  %v179_v10 = vld [vmem:[#allocation7 + $0x8] sm:$0xff]  ;;  %s383_s28 = sshll.u32 %s719_s27, 4  ;;  %s384_s28 = int_to_ptr.vmem [resolvable:$true] %s383_s28 }
  0x4c   :  { %v527_v11 = vpack.c.bf16 %v179_v10, %v178_v9  ;;  %v180_v12 = vld [vmem:[#allocation7 + $0x10] sm:$0xff]  ;;  %v181_v13 = vld [vmem:[#allocation7 + $0x18] sm:$0xff]  ;;  %v182_v15 = vld [vmem:[#allocation7 + $0x20] sm:$0xff]  ;;  %s680_s29 = scalar_lea.vmem %s384_s28, 128  ;;  %p685_p5 = scmp.lt.s32.totalorder %s384_s28, %s384_s28 }
  0x4d   :  { %522 = vmatpush3.bf16.msra.mxu0 %v521_v5  ;;  %v530_v14 = vpack.c.bf16 %v181_v13, %v180_v12  ;;  %v183_v16 = vld [vmem:[#allocation7 + $0x28] sm:$0xff]  ;;  %v184_v18 = vld [vmem:[#allocation7 + $0x30] sm:$0xff]  ;;  %v185_v19 = vld [vmem:[#allocation7 + $0x38] sm:$0xff]  ;;  %p681_p4 = scmp.ne.s32.totalorder %s384_s28, %s680_s29  ;;  %p686_p6 = scmp.lt.s32.totalorder %s680_s29, %s680_s29 }
  0x4e   :  { %523 = vmatprep.subr.bf16.mxu0 %v716_v0  ;;  %528 = vmatpush3.bf16.msra.mxu1 %v527_v11  ;;  %v533_v17 = vpack.c.bf16 %v183_v16, %v182_v15  ;;  %v536_v20 = vpack.c.bf16 %v185_v19, %v184_v18  ;;  %v186_v21 = vld [vmem:[#allocation7 + $0x40] sm:$0xff]  ;;  %v187_v22 = vld [vmem:[#allocation7 + $0x48] sm:$0xff]  ;;  %v188_v24 = vld [vmem:[#allocation7 + $0x50] sm:$0xff] }
  0x4f   :  { %529 = vmatprep.subr.bf16.mxu1 %v716_v0  ;;  %v539_v23 = vpack.c.bf16 %v187_v22, %v186_v21  ;;  %v189_v25 = vld [vmem:[#allocation7 + $0x58] sm:$0xff]  ;;  %v190_v27 = vld [vmem:[#allocation7 + $0x60] sm:$0xff]  ;;  %v191_v28 = vld [vmem:[#allocation7 + $0x68] sm:$0xff]  ;;  %p687_p7 = por %p686_p6, %p685_p5 }
  0x50   :  { %v542_v26 = vpack.c.bf16 %v189_v25, %v188_v24  ;;  %v545_v29 = vpack.c.bf16 %v191_v28, %v190_v27  ;;  %v192_v30 = vld [vmem:[#allocation7 + $0x70] sm:$0xff]  ;;  %v193_v31 = vld [vmem:[#allocation7 + $0x78] sm:$0xff]  ;;  %v283_v48 = vld [vmem:[#allocation8] sm:$0xff] }
  0x51   :  { %525 = vmatpush3.bf16.msra.mxu0 %v524_v7  ;;  %v548_v32 = vpack.c.bf16 %v193_v31, %v192_v30  ;;  %v394_v33 = vld [vmem:[%s861_s2] ss:$0 sm:$0xff]  ;;  %v284_v49 = vld [vmem:[#allocation8 + $0x8] sm:$0xff]  ;;  %v285_v51 = vld [vmem:[#allocation8 + $0x10] sm:$0xff]  ;;  %p688_p8 = pnand %p687_p7, %p681_p4 }
  0x52   :  { %550 = vmatprep.subr.bf16.mxu0 %v716_v0  ;;  %531 = vmatpush3.bf16.msra.mxu1 %v530_v14  ;;  %v551_v50 = vpack.c.bf16 %v284_v49, %v283_v48  ;;  %v286_v52 = vld [vmem:[#allocation8 + $0x18] sm:$0xff]  ;;  %v287_v54 = vld [vmem:[#allocation8 + $0x20] sm:$0xff]  ;;  %v288_v55 = vld [vmem:[#allocation8 + $0x28] sm:$0xff] }
  0x53   :  { %532 = vmatprep.subr.bf16.mxu1 %v716_v0  ;;  %v554_v53 = vpack.c.bf16 %v286_v52, %v285_v51  ;;  %v557_v56 = vpack.c.bf16 %v288_v55, %v287_v54  ;;  %v289_v57 = vld [vmem:[#allocation8 + $0x30] sm:$0xff]  ;;  %v290_v58 = vld [vmem:[#allocation8 + $0x38] sm:$0xff]  ;;  %v291_v60 = vld [vmem:[#allocation8 + $0x40] sm:$0xff] }
  0x54   :  { %448 = vmatmul.mubr.msk.f32.vlgmr.msra.gmra.mrb[0].mxu0 %vm92_vm1, %v80_v8  ;;  %v560_v59 = vpack.c.bf16 %v290_v58, %v289_v57  ;;  %v292_v61 = vld [vmem:[#allocation8 + $0x48] sm:$0xff]  ;;  %v293_v63 = vld [vmem:[#allocation8 + $0x50] sm:$0xff]  ;;  %v295_v3 = vld [vmem:[#allocation8 + $0x60] sm:$0xff] }
  0x55   :  { %517 = vmatprep.mubr.msk.f32.mxu0 %vm717_vm0, %v718_v1  ;;  %552 = vmatpush3.bf16.msra.mxu0 %v551_v50  ;;  %v563_v62 = vpack.c.bf16 %v292_v61, %v291_v60  ;;  %v294_v1 = vld [vmem:[#allocation8 + $0x58] sm:$0xff]  ;;  %v296_v4 = vld [vmem:[#allocation8 + $0x68] sm:$0xff]  ;;  %v297_v6 = vld [vmem:[#allocation8 + $0x70] sm:$0xff] }
  0x56   :  { %534 = vmatpush3.bf16.msra.mxu1 %v533_v17  ;;  %553 = vmatprep.subr.bf16.mxu0 %v716_v0  ;;  %v566_v2 = vpack.c.bf16 %v294_v1, %v293_v63  ;;  %v569_v5 = vpack.c.bf16 %v296_v4, %v295_v3  ;;  %v298_v7 = vld [vmem:[#allocation8 + $0x78] sm:$0xff] }
  0x57   :  { %535 = vmatprep.subr.bf16.mxu1 %v716_v0  ;;  %v572_v8 = vpack.c.bf16 %v298_v7, %v297_v6  ;;  %v397_v9 = vld [vmem:[%s863_s4] ss:$0 sm:$0xff] }
  0x59   :  { %555 = vmatpush3.bf16.msra.mxu0 %v554_v53 }
  0x5a   :  { %537 = vmatpush3.bf16.msra.mxu1 %v536_v20  ;;  %556 = vmatprep.subr.bf16.mxu0 %v716_v0 }
  0x5b   :  { %538 = vmatprep.subr.bf16.mxu1 %v716_v0 }
  0x5d   :  { %558 = vmatpush3.bf16.msra.mxu0 %v557_v56 }
  0x5e   :  { %540 = vmatpush3.bf16.msra.mxu1 %v539_v23  ;;  %559 = vmatprep.subr.bf16.mxu0 %v716_v0  ;;  %v399_v23 = vld [vmem:[%s865_s6] ss:$0 sm:$0xff] }
  0x5f   :  { %541 = vmatprep.subr.bf16.mxu1 %v716_v0 }
  0x61   :  { %561 = vmatpush3.bf16.msra.mxu0 %v560_v59 }
  0x62   :  { %543 = vmatpush3.bf16.msra.mxu1 %v542_v26  ;;  %562 = vmatprep.subr.bf16.mxu0 %v716_v0 }
  0x63   :  { %544 = vmatprep.subr.bf16.mxu1 %v716_v0 }
  0x65   :  { %564 = vmatpush3.bf16.msra.mxu0 %v563_v62 }
  0x66   :  { %546 = vmatpush3.bf16.msra.mxu1 %v545_v29  ;;  %565 = vmatprep.subr.bf16.mxu0 %v716_v0 }
  0x67   :  { %547 = vmatprep.subr.bf16.mxu1 %v716_v0 }
  0x69   :  { %567 = vmatpush3.bf16.msra.mxu0 %v566_v2 }
  0x6a   :  { %549 = vmatpush3.bf16.msra.mxu1 %v548_v32  ;;  %568 = vmatprep.subr.bf16.mxu0 %v716_v0 }
  0x6d   :  { %570 = vmatpush3.bf16.msra.mxu0 %v569_v5 }
  0x6e   :  { %571 = vmatprep.subr.bf16.mxu0 %v716_v0 }
  0x71   :  { %573 = vmatpush3.bf16.msra.mxu0 %v572_v8 }
 0x127   :  { %v162_v34 = vpop.f32.mrb[0].mxu0 }
 0x128   :  { %v163_v35 = vadd.f32 %v394_v33, %v162_v34  ;;  %v449_v36 = vpop.f32.mrb[1].mxu0 }
 0x12a   :  { %v166_v37 = vmin.f32 %v163_v35, 20.0  ;;  %vm175_vm2 = vcmp.gt.f32.partialorder %v163_v35, 20.0 }
 0x12c   :  { %v167_v38 = vmul.f32 1.442695, %v166_v37 }
 0x12e   :  { %584 = vpow2.f32 %v167_v38 }
 0x138   :  { %v585_v39 = vpop.eup %584 }
 0x139   :  { %v169_v40 = vadd.f32 1.0, %v585_v39 }
 0x13b   :  { %v170_v41 = vmul.f32 %v169_v40, %v169_v40 }
 0x13d   :  { %v172_v42 = vadd.f32 1.0, %v170_v41  ;;  %v396_v43 = vadd.f32 -1.0, %v170_v41 }
 0x13f   :  { %586 = vrcp.f32 %v172_v42 }
 0x149   :  { %v587_v44 = vpop.eup %586 }
 0x14a   :  { %v174_v45 = vmul.f32 %v587_v44, %v396_v43 }
 0x14c   :  { %v176_v46 = vsel %vm175_vm2, 1.0, %v174_v45 }
 0x14d   :  { %v177_v47 = vmul.f32 %v176_v46, %v163_v35 }
 0x14f   :  { %483 = vmatmul.mubr.f32.vlgmr.msra.gmra.mrb[0].mxu1 %v177_v47 }
 0x222   :  { %v267_v10 = vpop.f32.mrb[0].mxu1 }
 0x223   :  { %v268_v11 = vadd.f32 %v397_v9, %v267_v10  ;;  %v484_v12 = vpop.f32.mrb[1].mxu1 }
 0x225   :  { %v271_v13 = vmin.f32 %v268_v11, 20.0  ;;  %vm280_vm3 = vcmp.gt.f32.partialorder %v268_v11, 20.0 }
 0x227   :  { %v272_v14 = vmul.f32 1.442695, %v271_v13 }
 0x229   :  { %588 = vpow2.f32 %v272_v14 }
 0x233   :  { %v589_v15 = vpop.eup %588 }
 0x234   :  { %v274_v16 = vadd.f32 1.0, %v589_v15 }
 0x236   :  { %v275_v17 = vmul.f32 %v274_v16, %v274_v16 }
 0x238   :  { %v277_v18 = vadd.f32 1.0, %v275_v17  ;;  %v398_v0 = vadd.f32 -1.0, %v275_v17 }
 0x23a   :  { %590 = vrcp.f32 %v277_v18 }
 0x244   :  { %v591_v19 = vpop.eup %590 }
 0x245   :  { %v279_v20 = vmul.f32 %v591_v19, %v398_v0 }
 0x247   :  { %v281_v21 = vsel %vm280_vm3, 1.0, %v279_v20 }
 0x248   :  { %v282_v22 = vmul.f32 %v281_v21, %v268_v11 }
 0x24a   :  { %518 = vmatmul.mubr.f32.vlgmr.msra.gmra.mrb[2].mxu0 %v282_v22 }
 0x31d   :  { %v372_v24 = vpop.f32.mrb[2].mxu0 }
 0x31e   :  { %v373_v25 = vadd.f32 %v399_v23, %v372_v24  ;;  %v519_v26 = vpop.f32.mrb[3].mxu0 }
 0x320   :  { %376 = vst [vmem:[#allocation10] sm:$0xff] %v373_v25 }
 0x321   :  { %691 = shalt.err (!%p688_p8)
}
 0x322   :  { %s692_s9 = scalar_lea.hbm %s866_s7, 128 }
 0x323   :  { %p693_p9 = scmp.ne.s32.totalorder %s866_s7, %s692_s9  ;;  %p696_p10 = scmp.lt.u32.totalorder %s692_s9, %s866_s7 }
 0x325   :  { %p698_p11 = pnand %p696_p10, %p693_p9 }
 0x327   :  { %701 = shalt.err (!%p698_p11)
}
 0x328   :  { %386 = dma.vmem_to_hbm [thread:$0]  %s384_s28, 128, %s866_s7, [#allocation4]  }
 0x329   :  { %708 = dma.done.wait [#allocation4], 128  }
 0x32a   :  { %709 = vsyncadd [#allocation4], 4294967168 }
 0x32b   :  { %390 = vsyncpa [#allocation3], 1 }
 0x32c   :  { %391 = vsyncpa [#allocation6], 1 }
 0x32d   :  { %392 = vsyncpa [#allocation9], 1 }
 0x32e   :  { %393 = vsyncpa [#allocation4], 1 }

</bundles_post_ra>
